<compile_context>
chip_gen: v5e
topology: v5e:2x2
jax: 0.10.0
libtpu: 0.0.40
codegen_flags: <defaults>
</compile_context>

<pallas_src>
import jax
import jax.numpy as jnp
from jax.experimental import pallas as pl
from jax.experimental.pallas import tpu as pltpu


_BN_EPS = 1e-5
_INV_SQRT2 = 0.7071067811865476


def _round_up(n, m):
    return ((n + m - 1) // m) * m


def _make_fused_mlp_kernel(num_layers):
    """Kernel refs layout: (x, w_0, gb_0, w_1, gb_1, ..., w_{L-1}, gb_{L-1}, out)."""

    def kernel(*refs):
        x_ref = refs[0]
        o_ref = refs[-1]

        h = x_ref[...].astype(jnp.float32)
        for i in range(num_layers):  # unrolled at trace time; shapes differ per layer
            w_ref = refs[1 + 2 * i]
            gb_ref = refs[2 + 2 * i]

            # Linear (bias omitted: exactly cancelled by BN mean subtraction).
            y = jnp.dot(h, w_ref[...].astype(jnp.float32),
                        preferred_element_type=jnp.float32)

            # BatchNorm1d, training mode: batch mean / biased variance, eps=1e-5.
            mean = jnp.mean(y, axis=0, keepdims=True)
            c = y - mean
            var = jnp.mean(c * c, axis=0, keepdims=True)
            # Fold gamma into the rsqrt scale: single FMA per element.
            scale = gb_ref[0:1, :] * jax.lax.rsqrt(var + jnp.float32(_BN_EPS))
            y = c * scale + gb_ref[1:2, :]

            # Exact GELU (matches nn.GELU() default).
            y = 0.5 * y * (1.0 + jax.lax.erf(y * jnp.float32(_INV_SQRT2)))
            h = y

        o_ref[...] = h.astype(o_ref.dtype)

    return kernel


def init_mlp_params(key, in_dim, out_dim, hidden_dim):
    """PyTorch-like init.  Returns list of (W[(in,out)], gamma[(out,)], beta[(out,)]).

    The Linear bias is intentionally not created: with training-mode BatchNorm
    immediately after each Linear it has no effect on the forward output.
    Weights are stored pre-transposed as (in, out) so the kernel does x @ W.
    """
    dims = [in_dim] + list(hidden_dim) + [out_dim]
    params = []
    for i in range(len(dims) - 1):
        k_in, k_out = dims[i], dims[i + 1]
        key, kw = jax.random.split(key)
        bound = float(k_in) ** -0.5
        w = jax.random.uniform(kw, (k_in, k_out), jnp.float32, -bound, bound)
        gamma = jnp.ones((k_out,), jnp.float32)
        beta = jnp.zeros((k_out,), jnp.float32)
        params.append((w, gamma, beta))
    return params


def _pad_params(params):
    """Zero-pad feature dims to multiples of 128 and pack gamma/beta -> (2, N)."""
    padded = []
    for (w, gamma, beta) in params:
        k_in, k_out = w.shape
        k_pad = _round_up(k_in, 128)
        n_pad = _round_up(k_out, 128)
        w_p = jnp.zeros((k_pad, n_pad), w.dtype).at[:k_in, :k_out].set(w)
        gb = jnp.zeros((2, n_pad), jnp.float32)
        gb = gb.at[0, :k_out].set(gamma).at[1, :k_out].set(beta)
        padded.append((w_p, gb))
    return padded


def make_mlp_forward(params, out_dim):
    """Build a jitted forward fn: x (B, in_dim) -> (B, out_dim)."""
    padded = _pad_params(params)          # done once, outside the kernel
    num_layers = len(padded)
    kernel = _make_fused_mlp_kernel(num_layers)
    k0_pad = padded[0][0].shape[0]
    n_last_pad = padded[-1][0].shape[1]
    in_dim = params[0][0].shape[0]

    @jax.jit
    def forward(x):
        b = x.shape[0]
        # Zero-pad the input-feature axis only (padding the batch would corrupt
        # the BN statistics).
        x_p = x if in_dim == k0_pad else jnp.pad(x, ((0, 0), (0, k0_pad - in_dim)))

        flat_inputs = [x_p]
        in_specs = [pl.BlockSpec((b, k0_pad), lambda i: (0, 0))]
        for (w_p, gb) in padded:
            flat_inputs.append(w_p)
            flat_inputs.append(gb)
            in_specs.append(pl.BlockSpec(w_p.shape, lambda i: (0, 0)))
            in_specs.append(pl.BlockSpec(gb.shape, lambda i: (0, 0)))

        out_p = pl.pallas_call(
            kernel,
            out_shape=jax.ShapeDtypeStruct((b, n_last_pad), x.dtype),
            grid=(1,),                     # single invocation: no per-step overhead
            in_specs=in_specs,
            out_specs=pl.BlockSpec((b, n_last_pad), lambda i: (0, 0)),
            compiler_params=pltpu.CompilerParams(
                dimension_semantics=("arbitrary",)),
        )(*flat_inputs)
        return out_p[:, :out_dim]

    return forward


def _mlp_reference(x, params):
    """Pure-JAX reference with identical math (for a sanity check)."""
    h = x.astype(jnp.float32)
    for (w, gamma, beta) in params:
        y = h @ w
        mean = jnp.mean(y, axis=0, keepdims=True)
        var = jnp.mean((y - mean) ** 2, axis=0, keepdims=True)
        y = (y - mean) * jax.lax.rsqrt(var + _BN_EPS)
        y = y * gamma[None, :] + beta[None, :]
        h = 0.5 * y * (1.0 + jax.lax.erf(y * _INV_SQRT2))
    return h


if __name__ == "__main__":
    key = jax.random.PRNGKey(0)
    kx, kp = jax.random.split(key)

    # Small shapes consistent with the module's forward (2-D (batch, features)
    # input is required by BatchNorm1d).
    batch = 8
    in_dim = 32
    out_dim = 64
    hidden_dim = [128, 256, 128]   # shrunk from the default [512,1024,...] for a small test

    x = jax.random.normal(kx, (batch, in_dim), jnp.float32)
    params = init_mlp_params(kp, in_dim, out_dim, hidden_dim)

    forward = make_mlp_forward(params, out_dim)
    y = forward(x)
    jax.block_until_ready(y)

    assert y.shape == (batch, out_dim), y.shape
    y_ref = _mlp_reference(x, params)
    assert bool(jnp.all(jnp.isfinite(y)))
    assert bool(jnp.allclose(y, y_ref, atol=5e-2, rtol=5e-2)), (
        float(jnp.max(jnp.abs(y - y_ref))))
    print("KERNEL_OK")
</pallas_src>

<mosaic_0001>
module attributes {stable_mosaic.version = 11 : i64} {
  func.func @kernel(%arg0: i32, %arg1: memref<8x128xf32, #tpu.memory_space<vmem>>, %arg2: memref<128x128xf32, #tpu.memory_space<vmem>>, %arg3: memref<2x128xf32, #tpu.memory_space<vmem>>, %arg4: memref<128x256xf32, #tpu.memory_space<vmem>>, %arg5: memref<2x256xf32, #tpu.memory_space<vmem>>, %arg6: memref<256x128xf32, #tpu.memory_space<vmem>>, %arg7: memref<2x128xf32, #tpu.memory_space<vmem>>, %arg8: memref<128x128xf32, #tpu.memory_space<vmem>>, %arg9: memref<2x128xf32, #tpu.memory_space<vmem>>, %arg10: memref<8x128xf32, #tpu.memory_space<vmem>>) attributes {dimension_semantics = [#tpu.dimension_semantics<arbitrary>], iteration_bounds = array<i64: 1>, scalar_prefetch = 0 : i64, scratch_operands = 0 : i64, tpu.core_type = #tpu.core_type<tc>, window_params = [{pipeline_mode = #tpu.pipeline_mode<synchronous>, transform_indices = @transform_0, window_bounds = array<i64: 8, 128>}, {pipeline_mode = #tpu.pipeline_mode<synchronous>, transform_indices = @transform_1, window_bounds = array<i64: 128, 128>}, {pipeline_mode = #tpu.pipeline_mode<synchronous>, transform_indices = @transform_2, window_bounds = array<i64: 2, 128>}, {pipeline_mode = #tpu.pipeline_mode<synchronous>, transform_indices = @transform_3, window_bounds = array<i64: 128, 256>}, {pipeline_mode = #tpu.pipeline_mode<synchronous>, transform_indices = @transform_4, window_bounds = array<i64: 2, 256>}, {pipeline_mode = #tpu.pipeline_mode<synchronous>, transform_indices = @transform_5, window_bounds = array<i64: 256, 128>}, {pipeline_mode = #tpu.pipeline_mode<synchronous>, transform_indices = @transform_6, window_bounds = array<i64: 2, 128>}, {pipeline_mode = #tpu.pipeline_mode<synchronous>, transform_indices = @transform_7, window_bounds = array<i64: 128, 128>}, {pipeline_mode = #tpu.pipeline_mode<synchronous>, transform_indices = @transform_8, window_bounds = array<i64: 2, 128>}, {pipeline_mode = #tpu.pipeline_mode<synchronous>, transform_indices = @transform_9, window_bounds = array<i64: 8, 128>}]} {
    %c0 = arith.constant 0 : index
    %c0_0 = arith.constant 0 : index
    %0 = vector.load %arg1[%c0, %c0_0] : memref<8x128xf32, #tpu.memory_space<vmem>>, vector<8x128xf32>
    %c0_1 = arith.constant 0 : index
    %c0_2 = arith.constant 0 : index
    %1 = vector.load %arg2[%c0_1, %c0_2] : memref<128x128xf32, #tpu.memory_space<vmem>>, vector<128x128xf32>
    %cst = arith.constant dense<0.000000e+00> : vector<8x128xf32>
    %2 = tpu.matmul %0, %1, %cst {dimension_numbers = #tpu.dot_dimension_numbers<[1], [0], [0], [1], [0, 0, 1, 1], [], []>} : vector<8x128xf32>, vector<128x128xf32>, vector<8x128xf32> -> vector<8x128xf32>
    %cst_3 = arith.constant dense<0.000000e+00> : vector<128xf32>
    %3 = vector.multi_reduction <add>, %2, %cst_3 [0] : vector<8x128xf32> to vector<128xf32>
    %4 = vector.shape_cast %3 : vector<128xf32> to vector<1x128xf32>
    %cst_4 = arith.constant 8.000000e+00 : f32
    %5 = vector.broadcast %cst_4 : f32 to vector<1x128xf32>
    %6 = arith.divf %4, %5 : vector<1x128xf32>
    %7 = vector.broadcast %6 : vector<1x128xf32> to vector<8x128xf32>
    %8 = arith.subf %2, %7 : vector<8x128xf32>
    %9 = arith.mulf %8, %8 : vector<8x128xf32>
    %cst_5 = arith.constant dense<0.000000e+00> : vector<128xf32>
    %10 = vector.multi_reduction <add>, %9, %cst_5 [0] : vector<8x128xf32> to vector<128xf32>
    %11 = vector.shape_cast %10 : vector<128xf32> to vector<1x128xf32>
    %cst_6 = arith.constant 8.000000e+00 : f32
    %12 = vector.broadcast %cst_6 : f32 to vector<1x128xf32>
    %13 = arith.divf %11, %12 : vector<1x128xf32>
    %c0_7 = arith.constant 0 : index
    %c0_8 = arith.constant 0 : index
    %14 = vector.load %arg3[%c0_7, %c0_8] : memref<2x128xf32, #tpu.memory_space<vmem>>, vector<1x128xf32>
    %cst_9 = arith.constant 9.99999974E-6 : f32
    %15 = vector.broadcast %cst_9 : f32 to vector<1x128xf32>
    %16 = arith.addf %13, %15 : vector<1x128xf32>
    %17 = math.rsqrt %16 : vector<1x128xf32>
    %18 = arith.mulf %14, %17 : vector<1x128xf32>
    %19 = vector.broadcast %18 : vector<1x128xf32> to vector<8x128xf32>
    %20 = arith.mulf %8, %19 : vector<8x128xf32>
    %c1 = arith.constant 1 : index
    %c0_10 = arith.constant 0 : index
    %21 = vector.load %arg3[%c1, %c0_10] : memref<2x128xf32, #tpu.memory_space<vmem>>, vector<1x128xf32>
    %22 = vector.broadcast %21 : vector<1x128xf32> to vector<8x128xf32>
    %23 = arith.addf %20, %22 : vector<8x128xf32>
    %cst_11 = arith.constant 5.000000e-01 : f32
    %24 = vector.broadcast %cst_11 : f32 to vector<8x128xf32>
    %25 = arith.mulf %24, %23 : vector<8x128xf32>
    %cst_12 = arith.constant 0.707106769 : f32
    %26 = vector.broadcast %cst_12 : f32 to vector<8x128xf32>
    %27 = arith.mulf %23, %26 : vector<8x128xf32>
    %28 = math.erf %27 : vector<8x128xf32>
    %cst_13 = arith.constant 1.000000e+00 : f32
    %29 = vector.broadcast %cst_13 : f32 to vector<8x128xf32>
    %30 = arith.addf %29, %28 : vector<8x128xf32>
    %31 = arith.mulf %25, %30 : vector<8x128xf32>
    %c0_14 = arith.constant 0 : index
    %c0_15 = arith.constant 0 : index
    %32 = vector.load %arg4[%c0_14, %c0_15] : memref<128x256xf32, #tpu.memory_space<vmem>>, vector<128x256xf32>
    %cst_16 = arith.constant dense<0.000000e+00> : vector<8x256xf32>
    %33 = tpu.matmul %31, %32, %cst_16 {dimension_numbers = #tpu.dot_dimension_numbers<[1], [0], [0], [1], [0, 0, 1, 1], [], []>} : vector<8x128xf32>, vector<128x256xf32>, vector<8x256xf32> -> vector<8x256xf32>
    %cst_17 = arith.constant dense<0.000000e+00> : vector<256xf32>
    %34 = vector.multi_reduction <add>, %33, %cst_17 [0] : vector<8x256xf32> to vector<256xf32>
    %35 = vector.shape_cast %34 : vector<256xf32> to vector<1x256xf32>
    %cst_18 = arith.constant 8.000000e+00 : f32
    %36 = vector.broadcast %cst_18 : f32 to vector<1x256xf32>
    %37 = arith.divf %35, %36 : vector<1x256xf32>
    %38 = vector.broadcast %37 : vector<1x256xf32> to vector<8x256xf32>
    %39 = arith.subf %33, %38 : vector<8x256xf32>
    %40 = arith.mulf %39, %39 : vector<8x256xf32>
    %cst_19 = arith.constant dense<0.000000e+00> : vector<256xf32>
    %41 = vector.multi_reduction <add>, %40, %cst_19 [0] : vector<8x256xf32> to vector<256xf32>
    %42 = vector.shape_cast %41 : vector<256xf32> to vector<1x256xf32>
    %cst_20 = arith.constant 8.000000e+00 : f32
    %43 = vector.broadcast %cst_20 : f32 to vector<1x256xf32>
    %44 = arith.divf %42, %43 : vector<1x256xf32>
    %c0_21 = arith.constant 0 : index
    %c0_22 = arith.constant 0 : index
    %45 = vector.load %arg5[%c0_21, %c0_22] : memref<2x256xf32, #tpu.memory_space<vmem>>, vector<1x256xf32>
    %cst_23 = arith.constant 9.99999974E-6 : f32
    %46 = vector.broadcast %cst_23 : f32 to vector<1x256xf32>
    %47 = arith.addf %44, %46 : vector<1x256xf32>
    %48 = math.rsqrt %47 : vector<1x256xf32>
    %49 = arith.mulf %45, %48 : vector<1x256xf32>
    %50 = vector.broadcast %49 : vector<1x256xf32> to vector<8x256xf32>
    %51 = arith.mulf %39, %50 : vector<8x256xf32>
    %c1_24 = arith.constant 1 : index
    %c0_25 = arith.constant 0 : index
    %52 = vector.load %arg5[%c1_24, %c0_25] : memref<2x256xf32, #tpu.memory_space<vmem>>, vector<1x256xf32>
    %53 = vector.broadcast %52 : vector<1x256xf32> to vector<8x256xf32>
    %54 = arith.addf %51, %53 : vector<8x256xf32>
    %cst_26 = arith.constant 5.000000e-01 : f32
    %55 = vector.broadcast %cst_26 : f32 to vector<8x256xf32>
    %56 = arith.mulf %55, %54 : vector<8x256xf32>
    %cst_27 = arith.constant 0.707106769 : f32
    %57 = vector.broadcast %cst_27 : f32 to vector<8x256xf32>
    %58 = arith.mulf %54, %57 : vector<8x256xf32>
    %59 = math.erf %58 : vector<8x256xf32>
    %cst_28 = arith.constant 1.000000e+00 : f32
    %60 = vector.broadcast %cst_28 : f32 to vector<8x256xf32>
    %61 = arith.addf %60, %59 : vector<8x256xf32>
    %62 = arith.mulf %56, %61 : vector<8x256xf32>
    %c0_29 = arith.constant 0 : index
    %c0_30 = arith.constant 0 : index
    %63 = vector.load %arg6[%c0_29, %c0_30] : memref<256x128xf32, #tpu.memory_space<vmem>>, vector<256x128xf32>
    %cst_31 = arith.constant dense<0.000000e+00> : vector<8x128xf32>
    %64 = tpu.matmul %62, %63, %cst_31 {dimension_numbers = #tpu.dot_dimension_numbers<[1], [0], [0], [1], [0, 0, 1, 1], [], []>} : vector<8x256xf32>, vector<256x128xf32>, vector<8x128xf32> -> vector<8x128xf32>
    %cst_32 = arith.constant dense<0.000000e+00> : vector<128xf32>
    %65 = vector.multi_reduction <add>, %64, %cst_32 [0] : vector<8x128xf32> to vector<128xf32>
    %66 = vector.shape_cast %65 : vector<128xf32> to vector<1x128xf32>
    %cst_33 = arith.constant 8.000000e+00 : f32
    %67 = vector.broadcast %cst_33 : f32 to vector<1x128xf32>
    %68 = arith.divf %66, %67 : vector<1x128xf32>
    %69 = vector.broadcast %68 : vector<1x128xf32> to vector<8x128xf32>
    %70 = arith.subf %64, %69 : vector<8x128xf32>
    %71 = arith.mulf %70, %70 : vector<8x128xf32>
    %cst_34 = arith.constant dense<0.000000e+00> : vector<128xf32>
    %72 = vector.multi_reduction <add>, %71, %cst_34 [0] : vector<8x128xf32> to vector<128xf32>
    %73 = vector.shape_cast %72 : vector<128xf32> to vector<1x128xf32>
    %cst_35 = arith.constant 8.000000e+00 : f32
    %74 = vector.broadcast %cst_35 : f32 to vector<1x128xf32>
    %75 = arith.divf %73, %74 : vector<1x128xf32>
    %c0_36 = arith.constant 0 : index
    %c0_37 = arith.constant 0 : index
    %76 = vector.load %arg7[%c0_36, %c0_37] : memref<2x128xf32, #tpu.memory_space<vmem>>, vector<1x128xf32>
    %cst_38 = arith.constant 9.99999974E-6 : f32
    %77 = vector.broadcast %cst_38 : f32 to vector<1x128xf32>
    %78 = arith.addf %75, %77 : vector<1x128xf32>
    %79 = math.rsqrt %78 : vector<1x128xf32>
    %80 = arith.mulf %76, %79 : vector<1x128xf32>
    %81 = vector.broadcast %80 : vector<1x128xf32> to vector<8x128xf32>
    %82 = arith.mulf %70, %81 : vector<8x128xf32>
    %c1_39 = arith.constant 1 : index
    %c0_40 = arith.constant 0 : index
    %83 = vector.load %arg7[%c1_39, %c0_40] : memref<2x128xf32, #tpu.memory_space<vmem>>, vector<1x128xf32>
    %84 = vector.broadcast %83 : vector<1x128xf32> to vector<8x128xf32>
    %85 = arith.addf %82, %84 : vector<8x128xf32>
    %cst_41 = arith.constant 5.000000e-01 : f32
    %86 = vector.broadcast %cst_41 : f32 to vector<8x128xf32>
    %87 = arith.mulf %86, %85 : vector<8x128xf32>
    %cst_42 = arith.constant 0.707106769 : f32
    %88 = vector.broadcast %cst_42 : f32 to vector<8x128xf32>
    %89 = arith.mulf %85, %88 : vector<8x128xf32>
    %90 = math.erf %89 : vector<8x128xf32>
    %cst_43 = arith.constant 1.000000e+00 : f32
    %91 = vector.broadcast %cst_43 : f32 to vector<8x128xf32>
    %92 = arith.addf %91, %90 : vector<8x128xf32>
    %93 = arith.mulf %87, %92 : vector<8x128xf32>
    %c0_44 = arith.constant 0 : index
    %c0_45 = arith.constant 0 : index
    %94 = vector.load %arg8[%c0_44, %c0_45] : memref<128x128xf32, #tpu.memory_space<vmem>>, vector<128x128xf32>
    %cst_46 = arith.constant dense<0.000000e+00> : vector<8x128xf32>
    %95 = tpu.matmul %93, %94, %cst_46 {dimension_numbers = #tpu.dot_dimension_numbers<[1], [0], [0], [1], [0, 0, 1, 1], [], []>} : vector<8x128xf32>, vector<128x128xf32>, vector<8x128xf32> -> vector<8x128xf32>
    %cst_47 = arith.constant dense<0.000000e+00> : vector<128xf32>
    %96 = vector.multi_reduction <add>, %95, %cst_47 [0] : vector<8x128xf32> to vector<128xf32>
    %97 = vector.shape_cast %96 : vector<128xf32> to vector<1x128xf32>
    %cst_48 = arith.constant 8.000000e+00 : f32
    %98 = vector.broadcast %cst_48 : f32 to vector<1x128xf32>
    %99 = arith.divf %97, %98 : vector<1x128xf32>
    %100 = vector.broadcast %99 : vector<1x128xf32> to vector<8x128xf32>
    %101 = arith.subf %95, %100 : vector<8x128xf32>
    %102 = arith.mulf %101, %101 : vector<8x128xf32>
    %cst_49 = arith.constant dense<0.000000e+00> : vector<128xf32>
    %103 = vector.multi_reduction <add>, %102, %cst_49 [0] : vector<8x128xf32> to vector<128xf32>
    %104 = vector.shape_cast %103 : vector<128xf32> to vector<1x128xf32>
    %cst_50 = arith.constant 8.000000e+00 : f32
    %105 = vector.broadcast %cst_50 : f32 to vector<1x128xf32>
    %106 = arith.divf %104, %105 : vector<1x128xf32>
    %c0_51 = arith.constant 0 : index
    %c0_52 = arith.constant 0 : index
    %107 = vector.load %arg9[%c0_51, %c0_52] : memref<2x128xf32, #tpu.memory_space<vmem>>, vector<1x128xf32>
    %cst_53 = arith.constant 9.99999974E-6 : f32
    %108 = vector.broadcast %cst_53 : f32 to vector<1x128xf32>
    %109 = arith.addf %106, %108 : vector<1x128xf32>
    %110 = math.rsqrt %109 : vector<1x128xf32>
    %111 = arith.mulf %107, %110 : vector<1x128xf32>
    %112 = vector.broadcast %111 : vector<1x128xf32> to vector<8x128xf32>
    %113 = arith.mulf %101, %112 : vector<8x128xf32>
    %c1_54 = arith.constant 1 : index
    %c0_55 = arith.constant 0 : index
    %114 = vector.load %arg9[%c1_54, %c0_55] : memref<2x128xf32, #tpu.memory_space<vmem>>, vector<1x128xf32>
    %115 = vector.broadcast %114 : vector<1x128xf32> to vector<8x128xf32>
    %116 = arith.addf %113, %115 : vector<8x128xf32>
    %cst_56 = arith.constant 5.000000e-01 : f32
    %117 = vector.broadcast %cst_56 : f32 to vector<8x128xf32>
    %118 = arith.mulf %117, %116 : vector<8x128xf32>
    %cst_57 = arith.constant 0.707106769 : f32
    %119 = vector.broadcast %cst_57 : f32 to vector<8x128xf32>
    %120 = arith.mulf %116, %119 : vector<8x128xf32>
    %121 = math.erf %120 : vector<8x128xf32>
    %cst_58 = arith.constant 1.000000e+00 : f32
    %122 = vector.broadcast %cst_58 : f32 to vector<8x128xf32>
    %123 = arith.addf %122, %121 : vector<8x128xf32>
    %124 = arith.mulf %118, %123 : vector<8x128xf32>
    %c0_59 = arith.constant 0 : index
    %c0_60 = arith.constant 0 : index
    %125 = vector.load %arg10[%c0_59, %c0_60] : memref<8x128xf32, #tpu.memory_space<vmem>>, vector<8x128xf32>
    tpu.vector_store %arg10[%c0_59, %c0_60], %124 {strides = array<i32>} : memref<8x128xf32, #tpu.memory_space<vmem>>, vector<8x128xf32>,
    return
  }
  func.func @transform_0(%arg0: i32) -> (i32, i32) {
    %c0_i32 = arith.constant 0 : i32
    %c0_i32_0 = arith.constant 0 : i32
    %c0_i32_1 = arith.constant 0 : i32
    return %c0_i32, %c0_i32_0 : i32, i32
  }
  func.func @transform_1(%arg0: i32) -> (i32, i32) {
    %c0_i32 = arith.constant 0 : i32
    %c0_i32_0 = arith.constant 0 : i32
    %c0_i32_1 = arith.constant 0 : i32
    return %c0_i32, %c0_i32_0 : i32, i32
  }
  func.func @transform_2(%arg0: i32) -> (i32, i32) {
    %c0_i32 = arith.constant 0 : i32
    %c0_i32_0 = arith.constant 0 : i32
    %c0_i32_1 = arith.constant 0 : i32
    return %c0_i32, %c0_i32_0 : i32, i32
  }
  func.func @transform_3(%arg0: i32) -> (i32, i32) {
    %c0_i32 = arith.constant 0 : i32
    %c0_i32_0 = arith.constant 0 : i32
    %c0_i32_1 = arith.constant 0 : i32
    return %c0_i32, %c0_i32_0 : i32, i32
  }
  func.func @transform_4(%arg0: i32) -> (i32, i32) {
    %c0_i32 = arith.constant 0 : i32
    %c0_i32_0 = arith.constant 0 : i32
    %c0_i32_1 = arith.constant 0 : i32
    return %c0_i32, %c0_i32_0 : i32, i32
  }
  func.func @transform_5(%arg0: i32) -> (i32, i32) {
    %c0_i32 = arith.constant 0 : i32
    %c0_i32_0 = arith.constant 0 : i32
    %c0_i32_1 = arith.constant 0 : i32
    return %c0_i32, %c0_i32_0 : i32, i32
  }
  func.func @transform_6(%arg0: i32) -> (i32, i32) {
    %c0_i32 = arith.constant 0 : i32
    %c0_i32_0 = arith.constant 0 : i32
    %c0_i32_1 = arith.constant 0 : i32
    return %c0_i32, %c0_i32_0 : i32, i32
  }
  func.func @transform_7(%arg0: i32) -> (i32, i32) {
    %c0_i32 = arith.constant 0 : i32
    %c0_i32_0 = arith.constant 0 : i32
    %c0_i32_1 = arith.constant 0 : i32
    return %c0_i32, %c0_i32_0 : i32, i32
  }
  func.func @transform_8(%arg0: i32) -> (i32, i32) {
    %c0_i32 = arith.constant 0 : i32
    %c0_i32_0 = arith.constant 0 : i32
    %c0_i32_1 = arith.constant 0 : i32
    return %c0_i32, %c0_i32_0 : i32, i32
  }
  func.func @transform_9(%arg0: i32) -> (i32, i32) {
    %c0_i32 = arith.constant 0 : i32
    %c0_i32_0 = arith.constant 0 : i32
    %c0_i32_1 = arith.constant 0 : i32
    return %c0_i32, %c0_i32_0 : i32, i32
  }
}

</mosaic_0001>

<bundles_post_ra>
// kernel: forward.1
= control target key start
LH: loop header
LB: loop body
LE: loop exit
PB: predicated region body
PF: predicated region fallthrough
CT: control target
= control target key end

     0   :  { %14 = vsyncpa [#allocation3], 0  ;;  %s1068_s0 = inlined_call_operand.vmem [shape: f32[8,128], index: 0, kind: input, shape index: {}]   ;;  %s1069_s1 = inlined_call_operand.hbm [shape: f32[128,128], index: 1, kind: input, shape index: {}]   ;;  %s1070_s2 = inlined_call_operand.vmem [shape: f32[2,128], index: 2, kind: input, shape index: {}, may-alias: {2,6}]   ;;  %s1071_s3 = inlined_call_operand.hbm [shape: f32[128,256], index: 3, kind: input, shape index: {}]   ;;  %s1072_s4 = inlined_call_operand.vmem [shape: f32[2,256], index: 4, kind: input, shape index: {}]   ;;  %s1073_s5 = inlined_call_operand.hbm [shape: f32[256,128], index: 5, kind: input, shape index: {}]   ;;  %s1074_s6 = inlined_call_operand.vmem [shape: f32[2,128], index: 6, kind: input, shape index: {}, may-alias: {2,6}]   ;;  %s1075_s7 = inlined_call_operand.hbm [shape: f32[128,128], index: 7, kind: input, shape index: {}]   ;;  %s1076_s8 = inlined_call_operand.vmem [shape: f32[2,128], index: 8, kind: input, shape index: {}]   ;;  %s1077_s9 = inlined_call_operand.hbm [shape: f32[8,128], index: 9, kind: output, shape index: {}]  }
   0x1   :  { %15 = vsyncpa [#allocation6], 0 }
   0x2   :  { %16 = vsyncpa [#allocation9], 0  ;;  %s39_s11 = sshll.u32 %s1071_s3, 4  ;;  %s40_s11 = int_to_ptr.hbm [resolvable:$true] %s39_s11 }
   0x3   :  { %17 = vsyncpa [#allocation4], 0  ;;  %s909_s12 = smov [#allocation5]   ;;  %s24_s16 = sshll.u32 %s1069_s1, 4  ;;  %s25_s16 = int_to_ptr.hbm [resolvable:$true] %s24_s16 }
   0x4   :  { %s41_s13 = sshll.u32 %s909_s12, 4  ;;  %s910_s17 = smov 256   ;;  %s42_s13 = int_to_ptr.vmem [resolvable:$true] %s41_s13 }
   0x5   :  { %s911_s18 = smov 16   ;;  %s912_s19 = smov [#allocation2]  }
   0x6   :  { %47 = dma.hbm_to_vmem [thread:$0]  %s40_s11, 4096, %s42_s13, [#allocation6], %s910_s17, %s910_s17, %s911_s18  }
   0x7   :  { %s26_s20 = sshll.u32 %s912_s19, 4  ;;  %s913_s21 = smov 128   ;;  %s27_s20 = int_to_ptr.vmem [resolvable:$true] %s26_s20 }
   0x8   :  { %s914_s22 = smov 8   ;;  %s54_s24 = sshll.u32 %s1073_s5, 4  ;;  %s55_s24 = int_to_ptr.hbm [resolvable:$true] %s54_s24 }
   0x9   :  { %32 = dma.hbm_to_vmem [thread:$0]  %s25_s16, 2048, %s27_s20, [#allocation3], %s913_s21, %s913_s21, %s914_s22  }
   0xa   :  { %s915_s25 = smov [#allocation7]   ;;  %s69_s28 = sshll.u32 %s1075_s7, 4  ;;  %s70_s28 = int_to_ptr.hbm [resolvable:$true] %s69_s28 }
   0xb   :  { %s56_s26 = sshll.u32 %s915_s25, 4  ;;  %s916_s29 = smov [#allocation8]   ;;  %s57_s26 = int_to_ptr.vmem [resolvable:$true] %s56_s26 }
   0xc   :  { %62 = dma.hbm_to_vmem [thread:$0]  %s55_s24, 4096, %s57_s26, [#allocation6], %s913_s21, %s913_s21, %s914_s22  }
   0xd   :  { %s71_s30 = sshll.u32 %s916_s29, 4  ;;  %s72_s30 = int_to_ptr.vmem [resolvable:$true] %s71_s30 }
   0xe   :  { %77 = dma.hbm_to_vmem [thread:$0]  %s70_s28, 2048, %s72_s30, [#allocation9], %s913_s21, %s913_s21, %s914_s22  }
   0xf   :  { %901 = dma.done.wait [#allocation3], 2048  }
  0x10   :  { %902 = vsyncadd [#allocation3], 4294965248 }
  0x11   :  { %903 = dma.done.wait [#allocation6], 8192  }
  0x12   :  { %904 = vsyncadd [#allocation6], 4294959104 }
  0x13   :  { %905 = dma.done.wait [#allocation9], 2048  }
  0x14   :  { %906 = vsyncadd [#allocation9], 4294965248  ;;  %v112_v0 = vld [vmem:[#allocation2 + $0x78] sm:$0xff]  ;;  %v111_v1 = vld [vmem:[#allocation2 + $0x70] sm:$0xff]  ;;  %v917_v17 = vmov 8.0   ;;  %vm348_vm13 = vcmask 1040384  }
  0x15   :  { %113 = vmatpush.msra.mxu0 %v112_v0  ;;  %v110_v2 = vld [vmem:[#allocation2 + $0x68] sm:$0xff]  ;;  %v109_v3 = vld [vmem:[#allocation2 + $0x60] sm:$0xff]  ;;  %v108_v4 = vld [vmem:[#allocation2 + $0x58] sm:$0xff]  ;;  %759 = vrcp.f32 %v917_v17  ;;  %s728_s24 = sshll.u32 %s1077_s9, 4  ;;  %s729_s24 = int_to_ptr.hbm [resolvable:$true] %s728_s24 }
  0x16   :  { %v107_v5 = vld [vmem:[#allocation2 + $0x50] sm:$0xff]  ;;  %v106_v6 = vld [vmem:[#allocation2 + $0x48] sm:$0xff]  ;;  %v105_v7 = vld [vmem:[#allocation2 + $0x40] sm:$0xff] }
  0x17   :  { %114 = vmatpush.msra.mxu0 %v111_v1  ;;  %v104_v8 = vld [vmem:[#allocation2 + $0x38] sm:$0xff]  ;;  %v103_v9 = vld [vmem:[#allocation2 + $0x30] sm:$0xff]  ;;  %v102_v10 = vld [vmem:[#allocation2 + $0x28] sm:$0xff] }
  0x18   :  { %v101_v11 = vld [vmem:[#allocation2 + $0x20] sm:$0xff]  ;;  %v100_v12 = vld [vmem:[#allocation2 + $0x18] sm:$0xff]  ;;  %v99_v13 = vld [vmem:[#allocation2 + $0x10] sm:$0xff] }
  0x19   :  { %115 = vmatpush.msra.mxu0 %v110_v2  ;;  %v98_v14 = vld [vmem:[#allocation2 + $0x8] sm:$0xff]  ;;  %v97_v15 = vld [vmem:[#allocation2] sm:$0xff]  ;;  %v248_v38 = vld [vmem:[#allocation5 + $0xf0] sm:$0xff] }
  0x1a   :  { %v96_v16 = vld [vmem:[%s1068_s0] sm:$0xff]  ;;  %v249_v39 = vld [vmem:[#allocation5 + $0xf8] sm:$0xff]  ;;  %250 = vmatpush.msra.mxu1 %v248_v38  ;;  %v247_v41 = vld [vmem:[#allocation5 + $0xe8] sm:$0xff] }
  0x1b   :  { %116 = vmatpush.msra.mxu0 %v109_v3  ;;  %v760_v18 = vpop.eup %759  ;;  %v246_v40 = vld [vmem:[#allocation5 + $0xe0] sm:$0xff]  ;;  %270 = vmatpush.msra.mxu2 %v249_v39  ;;  %v244_v43 = vld [vmem:[#allocation5 + $0xd0] sm:$0xff]  ;;  %v245_v44 = vld [vmem:[#allocation5 + $0xd8] sm:$0xff] }
  0x1c   :  { %v140_v19 = vmul.f32 8.0, %v760_v18  ;;  %vm144_vm0 = vweird.f32 %v760_v18  ;;  %251 = vmatpush.msra.mxu1 %v246_v40  ;;  %v242_v46 = vld [vmem:[#allocation5 + $0xc0] sm:$0xff]  ;;  %v243_v47 = vld [vmem:[#allocation5 + $0xc8] sm:$0xff]  ;;  %v240_v49 = vld [vmem:[#allocation5 + $0xb0] sm:$0xff] }
  0x1d   :  { %117 = vmatpush.msra.mxu0 %v108_v4  ;;  %271 = vmatpush.msra.mxu2 %v247_v41  ;;  %v241_v50 = vld [vmem:[#allocation5 + $0xb8] sm:$0xff]  ;;  %v238_v52 = vld [vmem:[#allocation5 + $0xa0] sm:$0xff]  ;;  %v239_v53 = vld [vmem:[#allocation5 + $0xa8] sm:$0xff] }
  0x1e   :  { %v141_v20 = vsub.f32 1.0, %v140_v19  ;;  %252 = vmatpush.msra.mxu1 %v244_v43  ;;  %v236_v54 = vld [vmem:[#allocation5 + $0x90] sm:$0xff]  ;;  %v237_v55 = vld [vmem:[#allocation5 + $0x98] sm:$0xff]  ;;  %v234_v56 = vld [vmem:[#allocation5 + $0x80] sm:$0xff] }
  0x1f   :  { %118 = vmatpush.msra.mxu0 %v107_v5  ;;  %272 = vmatpush.msra.mxu2 %v245_v44  ;;  %v235_v57 = vld [vmem:[#allocation5 + $0x88] sm:$0xff]  ;;  %v232_v58 = vld [vmem:[#allocation5 + $0x70] sm:$0xff]  ;;  %v233_v59 = vld [vmem:[#allocation5 + $0x78] sm:$0xff] }
  0x20   :  { %v142_v23 = vmul.f32 %v760_v18, %v141_v20  ;;  %253 = vmatpush.msra.mxu1 %v242_v46  ;;  %v230_v61 = vld [vmem:[#allocation5 + $0x60] sm:$0xff]  ;;  %v231_v62 = vld [vmem:[#allocation5 + $0x68] sm:$0xff]  ;;  %v228_v0 = vld [vmem:[#allocation5 + $0x50] sm:$0xff] }
  0x21   :  { %119 = vmatpush.msra.mxu0 %v106_v6  ;;  %273 = vmatpush.msra.mxu2 %v243_v47  ;;  %v229_v1 = vld [vmem:[#allocation5 + $0x58] sm:$0xff]  ;;  %v226_v3 = vld [vmem:[#allocation5 + $0x40] sm:$0xff]  ;;  %v227_v4 = vld [vmem:[#allocation5 + $0x48] sm:$0xff] }
  0x22   :  { %v143_v26 = vadd.f32 %v760_v18, %v142_v23  ;;  %254 = vmatpush.msra.mxu1 %v240_v49  ;;  %v224_v6 = vld [vmem:[#allocation5 + $0x30] sm:$0xff]  ;;  %v218_v17 = vld [vmem:[#allocation5] sm:$0xff] }
  0x23   :  { %120 = vmatpush.msra.mxu0 %v105_v7  ;;  %274 = vmatpush.msra.mxu2 %v241_v50  ;;  %v225_v7 = vld [vmem:[#allocation5 + $0x38] sm:$0xff]  ;;  %v756_v20 = vld [vmem:[%s1070_s2 + $0x1] ss:$0 sm:$0xff] }
  0x24   :  { %v984_v29 = vsel %vm144_vm0, %v760_v18, %v143_v26  ;;  %255 = vmatpush.msra.mxu1 %v238_v52  ;;  %v219_v18 = vld [vmem:[#allocation5 + $0x8] sm:$0xff] }
  0x25   :  { %121 = vmatpush.msra.mxu0 %v104_v8  ;;  %275 = vmatpush.msra.mxu2 %v239_v53 }
  0x26   :  { %256 = vmatpush.msra.mxu1 %v236_v54 }
  0x27   :  { %122 = vmatpush.msra.mxu0 %v103_v9  ;;  %276 = vmatpush.msra.mxu2 %v237_v55  ;;  %v222_v9 = vld [vmem:[#allocation5 + $0x20] sm:$0xff] }
  0x28   :  { %257 = vmatpush.msra.mxu1 %v234_v56 }
  0x29   :  { %123 = vmatpush.msra.mxu0 %v102_v10  ;;  %277 = vmatpush.msra.mxu2 %v235_v57  ;;  %v223_v10 = vld [vmem:[#allocation5 + $0x28] sm:$0xff] }
  0x2a   :  { %258 = vmatpush.msra.mxu1 %v232_v58 }
  0x2b   :  { %124 = vmatpush.msra.mxu0 %v101_v11  ;;  %278 = vmatpush.msra.mxu2 %v233_v59  ;;  %v156_v11 = vld [vmem:[%s1070_s2] sm:$0x1] }
  0x2c   :  { %259 = vmatpush.msra.mxu1 %v230_v61 }
  0x2d   :  { %125 = vmatpush.msra.mxu0 %v100_v12  ;;  %279 = vmatpush.msra.mxu2 %v231_v62 }
  0x2e   :  { %260 = vmatpush.msra.mxu1 %v228_v0 }
  0x2f   :  { %126 = vmatpush.msra.mxu0 %v99_v13  ;;  %280 = vmatpush.msra.mxu2 %v229_v1  ;;  %v220_v13 = vld [vmem:[#allocation5 + $0x10] sm:$0xff] }
  0x30   :  { %261 = vmatpush.msra.mxu1 %v226_v3 }
  0x31   :  { %127 = vmatpush.msra.mxu0 %v98_v14  ;;  %281 = vmatpush.msra.mxu2 %v227_v4  ;;  %v221_v14 = vld [vmem:[#allocation5 + $0x18] sm:$0xff] }
  0x32   :  { %262 = vmatpush.msra.mxu1 %v224_v6 }
  0x33   :  { %128 = vmatpush.msra.mxu0 %v97_v15  ;;  %282 = vmatpush.msra.mxu2 %v225_v7 }
  0x34   :  { %129 = vmatmul.f32.vlgmr.msra.gmra.mxu0 %v96_v16  ;;  %263 = vmatpush.msra.mxu1 %v222_v9 }
  0x35   :  { %283 = vmatpush.msra.mxu2 %v223_v10 }
  0x36   :  { %264 = vmatpush.msra.mxu1 %v220_v13 }
  0x37   :  { %284 = vmatpush.msra.mxu2 %v221_v14 }
  0x38   :  { %265 = vmatpush.msra.mxu1 %v218_v17 }
  0x39   :  { %285 = vmatpush.msra.mxu2 %v219_v18 }
  0xb1   :  { %v130_v21 = vpop.f32.mrf.mxu0 }
  0xb2   :  { %v133_v22 = vrot.slane %v130_v21, 4 }
  0xb4   :  { %v134_v24 = vadd.f32 %v133_v22, %v130_v21 }
  0xb6   :  { %v135_v25 = vrot.slane %v134_v24, 2 }
  0xb8   :  { %v136_v27 = vadd.f32 %v135_v25, %v134_v24 }
  0xba   :  { %v137_v28 = vrot.slane %v136_v27, 1 }
  0xbc   :  { %v138_v30 = vadd.f32 %v137_v28, %v136_v27 }
  0xbe   :  { %v146_v31 = vmul.f32 %v984_v29, %v138_v30 }
  0xc0   :  { %v987_v32 = vsub.f32 %v130_v21, %v146_v31 }
  0xc2   :  { %v148_v33 = vmul.f32 %v987_v32, %v987_v32 }
  0xc4   :  { %v149_v34 = vrot.slane %v148_v33, 4 }
  0xc6   :  { %v150_v35 = vadd.f32 %v149_v34, %v148_v33 }
  0xc8   :  { %v151_v36 = vrot.slane %v150_v35, 2 }
  0xca   :  { %v152_v37 = vadd.f32 %v151_v36, %v150_v35 }
  0xcc   :  { %v153_v42 = vrot.slane %v152_v37, 1 }
  0xce   :  { %v154_v45 = vadd.f32 %v153_v42, %v152_v37 }
  0xd0   :  { %v155_v48 = vmul.f32 %v154_v45, %v984_v29 }
  0xd2   :  { %v157_v51 = vadd.f32 1e-05, %v155_v48 }
  0xd4   :  { %761 = vrsqrt.f32 %v157_v51  ;;  %vm164_vm2 = vweird.f32 %v157_v51 }
  0xda   :  { %v762_v60 = vpop.eup %761 }
  0xdb   :  { %v159_v63 = vmul.f32 %v762_v60, %v157_v51  ;;  %vm165_vm1 = vweird.f32 %v762_v60 }
  0xdc   :  { %vm166_vm3 = vmor %vm164_vm2, %vm165_vm1 }
  0xdd   :  { %v160_v2 = vmul.f32 %v762_v60, %v159_v63 }
  0xdf   :  { %v161_v5 = vmul.f32 0.5, %v160_v2 }
  0xe1   :  { %v162_v8 = vsub.f32 1.5, %v161_v5 }
  0xe3   :  { %v163_v12 = vmul.f32 %v762_v60, %v162_v8 }
  0xe5   :  { %v167_v15 = vsel %vm166_vm3, %v762_v60, %v163_v12 }
  0xe6   :  { %v168_v16 = vmul.f32 %v167_v15, %v156_v11 }
  0xe8   :  { %v169_v19 = vperm.slane %v168_v16, 0 }
  0xea   :  { %v170_v21 = vmul.f32 %v169_v19, %v987_v32 }
  0xec   :  { %v173_v22 = vadd.f32 %v756_v20, %v170_v21 }
  0xee   :  { %v175_v23 = vmul.f32 0.70710677, %v173_v22  ;;  %v174_v60 = vmul.f32 0.5, %v173_v22 }
  0xf0   :  { %v176_v24 = vmul.f32 %v175_v23, %v175_v23 }
  0xf2   :  { %v177_v25 = vmin.f32 %v176_v24, 16.0 }
  0xf4   :  { %v178_v26 = vmul.f32 2.1237322e-06, %v177_v25  ;;  %v189_v27 = vmul.f32 3.8918573e-05, %v177_v25 }
  0xf6   :  { %v179_v28 = vadd.f32 0.00028619796, %v178_v26  ;;  %v190_v30 = vadd.f32 0.001143296, %v189_v27 }
  0xf8   :  { %v180_v31 = vmul.f32 %v179_v28, %v177_v25  ;;  %v191_v33 = vmul.f32 %v190_v30, %v177_v25 }
  0xfa   :  { %v192_v34 = vadd.f32 0.014752088, %v191_v33  ;;  %v181_v35 = vadd.f32 0.0036580483, %v180_v31 }
  0xfc   :  { %v193_v36 = vmul.f32 %v192_v34, %v177_v25  ;;  %v182_v38 = vmul.f32 %v181_v35, %v177_v25 }
  0xfe   :  { %v194_v37 = vadd.f32 0.112945676, %v193_v36  ;;  %v183_v41 = vadd.f32 0.05243302, %v182_v38 }
 0x100   :  { %v195_v39 = vmul.f32 %v194_v37, %v177_v25  ;;  %v184_v43 = vmul.f32 %v183_v41, %v177_v25  ;;  %v470_v41 = vld [vmem:[#allocation7 + $0x70] sm:$0xff] }
 0x102   :  { %v196_v40 = vadd.f32 0.4994258, %v195_v39  ;;  %v185_v44 = vadd.f32 0.18741608, %v184_v43  ;;  %v471_v39 = vld [vmem:[#allocation7 + $0x78] sm:$0xff]  ;;  %v469_v43 = vld [vmem:[#allocation7 + $0x68] sm:$0xff] }
 0x103   :  { %488 = vmatpush.msra.mxu3 %v471_v39 }
 0x104   :  { %v197_v42 = vmul.f32 %v196_v40, %v177_v25  ;;  %v186_v46 = vmul.f32 %v185_v44, %v177_v25  ;;  %v487_v40 = vld [vmem:[#allocation7 + $0xf8] sm:$0xff]  ;;  %v485_v44 = vld [vmem:[#allocation7 + $0xe8] sm:$0xff] }
 0x105   :  { %508 = vmatpush.msrb.mxu0 %v487_v40  ;;  %489 = vmatpush.msra.mxu3 %v470_v41 }
 0x106   :  { %v198_v32 = vadd.f32 1.0, %v197_v42  ;;  %v187_v50 = vadd.f32 1.1283791, %v186_v46  ;;  %v486_v42 = vld [vmem:[#allocation7 + $0xf0] sm:$0xff]  ;;  %v484_v46 = vld [vmem:[#allocation7 + $0xe0] sm:$0xff] }
 0x107   :  { %509 = vmatpush.msrb.mxu0 %v486_v42  ;;  %490 = vmatpush.msra.mxu3 %v469_v43 }
 0x108   :  { %763 = vrcp.f32 %v198_v32  ;;  %v210_v49 = vand.u32 2147483648, %v198_v32  ;;  %v208_v52 = vand.u32 2147483647, %v198_v32  ;;  %vm204_vm5 = vweird.f32 %v198_v32 }
 0x109   :  { %v188_v55 = vmul.f32 %v187_v50, %v175_v23  ;;  %510 = vmatpush.msrb.mxu0 %v485_v44  ;;  %v467_v50 = vld [vmem:[#allocation7 + $0x58] sm:$0xff] }
 0x10a   :  { %v211_v54 = vor.u32 1.1754944e-38, %v210_v49  ;;  %vm209_vm7 = vcmp.eq.f32.partialorder %v208_v52, 8.507059e+37 }
 0x10b   :  { %511 = vmatpush.msrb.mxu0 %v484_v46 }
 0x10e   :  { %v764_v45 = vpop.eup %763 }
 0x10f   :  { %v200_v47 = vmul.f32 %v764_v45, %v198_v32  ;;  %vm205_vm4 = vweird.f32 %v764_v45 }
 0x110   :  { %vm206_vm6 = vmor %vm204_vm5, %vm205_vm4 }
 0x111   :  { %v201_v48 = vsub.f32 1.0, %v200_v47 }
 0x113   :  { %v202_v51 = vmul.f32 %v764_v45, %v201_v48 }
 0x115   :  { %v203_v53 = vadd.f32 %v764_v45, %v202_v51  ;;  %v483_v51 = vld [vmem:[#allocation7 + $0xd8] sm:$0xff] }
 0x116   :  { %512 = vmatpush.msrb.mxu0 %v483_v51 }
 0x117   :  { %v207_v56 = vsel %vm206_vm6, %v764_v45, %v203_v53  ;;  %v468_v45 = vld [vmem:[#allocation7 + $0x60] sm:$0xff]  ;;  %v466_v53 = vld [vmem:[#allocation7 + $0x50] sm:$0xff] }
 0x118   :  { %v212_v57 = vsel %vm209_vm7, %v211_v54, %v207_v56  ;;  %491 = vmatpush.msra.mxu3 %v468_v45  ;;  %v482_v54 = vld [vmem:[#allocation7 + $0xd0] sm:$0xff] }
 0x119   :  { %v213_v58 = vmul.f32 %v212_v57, %v188_v55  ;;  %v465_v57 = vld [vmem:[#allocation7 + $0x48] sm:$0xff]  ;;  %513 = vmatpush.msrb.mxu0 %v482_v54 }
 0x11a   :  { %492 = vmatpush.msra.mxu3 %v467_v50 }
 0x11b   :  { %v740_v59 = vclamps-f32 %v213_v58, 1.0  ;;  %v481_v58 = vld [vmem:[#allocation7 + $0xc8] sm:$0xff] }
 0x11c   :  { %493 = vmatpush.msra.mxu3 %v466_v53  ;;  %514 = vmatpush.msrb.mxu0 %v481_v58 }
 0x11d   :  { %v216_v61 = vadd.f32 1.0, %v740_v59 }
 0x11e   :  { %494 = vmatpush.msra.mxu3 %v465_v57 }
 0x11f   :  { %v217_v62 = vmul.f32 %v216_v61, %v174_v60  ;;  %v464_v60 = vld [vmem:[#allocation7 + $0x40] sm:$0xff] }
 0x120   :  { %v480_v61 = vld [vmem:[#allocation7 + $0xc0] sm:$0xff]  ;;  %495 = vmatpush.msra.mxu3 %v464_v60 }
 0x121   :  { %266 = vmatmul.f32.vlgmr.msra.gmra.mxu1 %v217_v62  ;;  %286 = vmatmul.f32.vlgmr.msra.gmra.mxu2 %v217_v62 }
 0x122   :  { %515 = vmatpush.msrb.mxu0 %v480_v61 }
 0x19e   :  { %v267_v63 = vpop.f32.mrf.mxu1 }
 0x19f   :  { %v290_v0 = vrot.slane %v267_v63, 4 }
 0x1a1   :  { %v291_v1 = vadd.f32 %v290_v0, %v267_v63  ;;  %v463_v0 = vld [vmem:[#allocation7 + $0x38] sm:$0xff] }
 0x1a2   :  { %496 = vmatpush.msra.mxu3 %v463_v0 }
 0x1a3   :  { %v292_v2 = vrot.slane %v291_v1, 2 }
 0x1a4   :  { %v287_v3 = vpop.f32.mrf.mxu2 }
 0x1a5   :  { %v293_v4 = vadd.f32 %v292_v2, %v291_v1  ;;  %v296_v5 = vrot.slane %v287_v3, 4  ;;  %v479_v1 = vld [vmem:[#allocation7 + $0xb8] sm:$0xff] }
 0x1a6   :  { %516 = vmatpush.msrb.mxu0 %v479_v1 }
 0x1a7   :  { %v294_v6 = vrot.slane %v293_v4, 1  ;;  %v297_v7 = vadd.f32 %v296_v5, %v287_v3  ;;  %v322_v5 = vld [vmem:[%s1072_s4] ss:$2 sm:$0x3] }
 0x1a9   :  { %v295_v8 = vadd.f32 %v294_v6, %v293_v4  ;;  %v298_v9 = vrot.slane %v297_v7, 2  ;;  %v478_v4 = vld [vmem:[#allocation7 + $0xb0] sm:$0xff] }
 0x1aa   :  { %517 = vmatpush.msrb.mxu0 %v478_v4 }
 0x1ab   :  { %v302_v10 = vmul.f32 %v295_v8, %v984_v29  ;;  %v299_v11 = vadd.f32 %v298_v9, %v297_v7  ;;  %v461_v8 = vld [vmem:[#allocation7 + $0x28] sm:$0xff] }
 0x1ac   :  { %v477_v9 = vld [vmem:[#allocation7 + $0xa8] sm:$0xff] }
 0x1ad   :  { %v1000_v12 = vsub.f32 %v267_v63, %v302_v10  ;;  %v300_v13 = vrot.slane %v299_v11, 1  ;;  %518 = vmatpush.msrb.mxu0 %v477_v9 }
 0x1af   :  { %v306_v14 = vmul.f32 %v1000_v12, %v1000_v12  ;;  %v301_v15 = vadd.f32 %v300_v13, %v299_v11  ;;  %v741_v11 = vld [vmem:[%s1072_s4 + $0x1] ss:$2 sm:$0x3] }
 0x1b1   :  { %v308_v16 = vrot.slane %v306_v14, 4  ;;  %v303_v17 = vmul.f32 %v301_v15, %v984_v29  ;;  %v476_v15 = vld [vmem:[#allocation7 + $0xa0] sm:$0xff] }
 0x1b2   :  { %519 = vmatpush.msrb.mxu0 %v476_v15 }
 0x1b3   :  { %v309_v18 = vadd.f32 %v308_v16, %v306_v14  ;;  %v1005_v19 = vsub.f32 %v287_v3, %v303_v17  ;;  %v462_v3 = vld [vmem:[#allocation7 + $0x30] sm:$0xff]  ;;  %v460_v14 = vld [vmem:[#allocation7 + $0x20] sm:$0xff]  ;;  %v363_v17 = vperm.slane %v741_v11, 1 }
 0x1b4   :  { %497 = vmatpush.msra.mxu3 %v462_v3 }
 0x1b5   :  { %v310_v20 = vrot.slane %v309_v18, 2  ;;  %v307_v21 = vmul.f32 %v1005_v19, %v1005_v19 }
 0x1b6   :  { %498 = vmatpush.msra.mxu3 %v461_v8 }
 0x1b7   :  { %v311_v22 = vadd.f32 %v310_v20, %v309_v18  ;;  %v314_v23 = vrot.slane %v307_v21, 4  ;;  %v459_v18 = vld [vmem:[#allocation7 + $0x18] sm:$0xff] }
 0x1b8   :  { %v475_v20 = vld [vmem:[#allocation7 + $0x98] sm:$0xff]  ;;  %499 = vmatpush.msra.mxu3 %v460_v14 }
 0x1b9   :  { %v312_v24 = vrot.slane %v311_v22, 1  ;;  %v315_v25 = vadd.f32 %v314_v23, %v307_v21  ;;  %520 = vmatpush.msrb.mxu0 %v475_v20 }
 0x1ba   :  { %500 = vmatpush.msra.mxu3 %v459_v18 }
 0x1bb   :  { %v313_v26 = vadd.f32 %v312_v24, %v311_v22  ;;  %v316_v27 = vrot.slane %v315_v25, 2  ;;  %v362_v22 = vperm.slane %v741_v11, 0  ;;  %v458_v24 = vld [vmem:[#allocation7 + $0x10] sm:$0xff] }
 0x1bc   :  { %501 = vmatpush.msra.mxu3 %v458_v24 }
 0x1bd   :  { %v320_v28 = vmul.f32 %v313_v26, %v984_v29  ;;  %v317_v30 = vadd.f32 %v316_v27, %v315_v25  ;;  %v474_v25 = vld [vmem:[#allocation7 + $0x90] sm:$0xff] }
 0x1be   :  { %521 = vmatpush.msrb.mxu0 %v474_v25 }
 0x1bf   :  { %v1010_v31 = vadd.f32 1e-05, %v320_v28  ;;  %v318_v33 = vrot.slane %v317_v30, 1  ;;  %v457_v28 = vld [vmem:[#allocation7 + $0x8] sm:$0xff] }
 0x1c0   :  { %502 = vmatpush.msra.mxu3 %v457_v28 }
 0x1c1   :  { %765 = vrsqrt.f32 %v1010_v31  ;;  %v319_v34 = vadd.f32 %v318_v33, %v317_v30  ;;  %vm331_vm12 = vweird.f32 %v1010_v31  ;;  %v473_v30 = vld [vmem:[#allocation7 + $0x88] sm:$0xff] }
 0x1c2   :  { %522 = vmatpush.msrb.mxu0 %v473_v30 }
 0x1c3   :  { %v321_v35 = vmul.f32 %v319_v34, %v984_v29  ;;  %v456_v34 = vld [vmem:[#allocation7] sm:$0xff] }
 0x1c4   :  { %503 = vmatpush.msra.mxu3 %v456_v34 }
 0x1c5   :  { %v324_v36 = vadd.f32 1e-05, %v321_v35  ;;  %v472_v35 = vld [vmem:[#allocation7 + $0x80] sm:$0xff] }
 0x1c6   :  { %523 = vmatpush.msrb.mxu0 %v472_v35 }
 0x1c7   :  { %v1014_v37 = vpop.eup %765  ;;  %767 = vrsqrt.f32 %v324_v36  ;;  %vm341_vm10 = vweird.f32 %v324_v36 }
 0x1c8   :  { %v326_v38 = vmul.f32 %v1014_v37, %v1010_v31  ;;  %vm332_vm9 = vweird.f32 %v1014_v37 }
 0x1c9   :  { %vm333_vm14 = vmor %vm331_vm12, %vm332_vm9 }
 0x1ca   :  { %v327_v32 = vmul.f32 %v1014_v37, %v326_v38 }
 0x1cc   :  { %v328_v48 = vmul.f32 0.5, %v327_v32 }
 0x1cd   :  { %v768_v47 = vpop.eup %767 }
 0x1ce   :  { %v336_v49 = vmul.f32 %v768_v47, %v324_v36  ;;  %v329_v55 = vsub.f32 1.5, %v328_v48  ;;  %vm342_vm8 = vweird.f32 %v768_v47 }
 0x1cf   :  { %vm343_vm11 = vmor %vm341_vm10, %vm342_vm8 }
 0x1d0   :  { %v337_v52 = vmul.f32 %v768_v47, %v336_v49  ;;  %v330_v62 = vmul.f32 %v1014_v37, %v329_v55 }
 0x1d2   :  { %v338_v56 = vmul.f32 0.5, %v337_v52  ;;  %v334_v7 = vsel %vm333_vm14, %v1014_v37, %v330_v62 }
 0x1d4   :  { %v339_v59 = vsub.f32 1.5, %v338_v56 }
 0x1d6   :  { %v340_v63 = vmul.f32 %v768_v47, %v339_v59 }
 0x1d8   :  { %v344_v2 = vsel %vm343_vm11, %v768_v47, %v340_v63 }
 0x1d9   :  { %v347_v6 = vrot.slane %v344_v2, 7 }
 0x1db   :  { %v349_v10 = vsel %vm348_vm13, %v334_v7, %v347_v6 }
 0x1dc   :  { %v351_v13 = vmul.f32 %v349_v10, %v322_v5 }
 0x1de   :  { %v354_v16 = vperm.slane %v351_v13, 1  ;;  %v353_v21 = vperm.slane %v351_v13, 0 }
 0x1e0   :  { %v358_v23 = vmul.f32 %v354_v16, %v1005_v19  ;;  %v357_v26 = vmul.f32 %v353_v21, %v1000_v12 }
 0x1e2   :  { %v1031_v27 = vadd.f32 %v363_v17, %v358_v23  ;;  %v1033_v31 = vadd.f32 %v362_v22, %v357_v26 }
 0x1e4   :  { %v1036_v33 = vmul.f32 0.70710677, %v1031_v27  ;;  %v1039_v19 = vmul.f32 0.70710677, %v1033_v31 }
 0x1e6   :  { %v412_v12 = vmul.f32 %v1036_v33, %v1036_v33  ;;  %v372_v36 = vmul.f32 %v1039_v19, %v1039_v19 }
 0x1e8   :  { %v413_v37 = vmin.f32 %v412_v12, 16.0  ;;  %v373_v38 = vmin.f32 %v372_v36, 16.0 }
 0x1ea   :  { %v374_v39 = vmul.f32 2.1237322e-06, %v373_v38  ;;  %v385_v40 = vmul.f32 3.8918573e-05, %v373_v38  ;;  %v414_v41 = vmul.f32 2.1237322e-06, %v413_v37 }
 0x1eb   :  { %v425_v42 = vmul.f32 3.8918573e-05, %v413_v37 }
 0x1ec   :  { %v375_v32 = vadd.f32 0.00028619796, %v374_v39  ;;  %v386_v43 = vadd.f32 0.001143296, %v385_v40  ;;  %v415_v44 = vadd.f32 0.00028619796, %v414_v41 }
 0x1ed   :  { %v426_v45 = vadd.f32 0.001143296, %v425_v42 }
 0x1ee   :  { %v376_v46 = vmul.f32 %v375_v32, %v373_v38  ;;  %v387_v47 = vmul.f32 %v386_v43, %v373_v38  ;;  %v416_v48 = vmul.f32 %v415_v44, %v413_v37 }
 0x1ef   :  { %v427_v49 = vmul.f32 %v426_v45, %v413_v37  ;;  %v368_v45 = vmul.f32 0.5, %v1033_v31 }
 0x1f0   :  { %v377_v50 = vadd.f32 0.0036580483, %v376_v46  ;;  %v388_v51 = vadd.f32 0.014752088, %v387_v47  ;;  %v417_v54 = vadd.f32 0.0036580483, %v416_v48 }
 0x1f1   :  { %v428_v52 = vadd.f32 0.014752088, %v427_v49  ;;  %v369_v47 = vmul.f32 0.5, %v1031_v27 }
 0x1f2   :  { %v389_v53 = vmul.f32 %v388_v51, %v373_v38  ;;  %v378_v56 = vmul.f32 %v377_v50, %v373_v38  ;;  %v418_v60 = vmul.f32 %v417_v54, %v413_v37 }
 0x1f3   :  { %v429_v55 = vmul.f32 %v428_v52, %v413_v37 }
 0x1f4   :  { %v390_v57 = vadd.f32 0.112945676, %v389_v53  ;;  %v379_v62 = vadd.f32 0.05243302, %v378_v56  ;;  %v419_v2 = vadd.f32 0.05243302, %v418_v60 }
 0x1f5   :  { %v430_v58 = vadd.f32 0.112945676, %v429_v55 }
 0x1f6   :  { %v391_v59 = vmul.f32 %v390_v57, %v373_v38  ;;  %v380_v4 = vmul.f32 %v379_v62, %v373_v38  ;;  %v420_v7 = vmul.f32 %v419_v2, %v413_v37  ;;  %v619_v2 = vld [vmem:[#allocation8 + $0x68] sm:$0xff] }
 0x1f7   :  { %v431_v61 = vmul.f32 %v430_v58, %v413_v37 }
 0x1f8   :  { %v392_v63 = vadd.f32 0.4994258, %v391_v59  ;;  %v381_v8 = vadd.f32 0.18741608, %v380_v4  ;;  %v421_v9 = vadd.f32 0.18741608, %v420_v7 }
 0x1f9   :  { %v432_v0 = vadd.f32 0.4994258, %v431_v61  ;;  %v618_v4 = vld [vmem:[#allocation8 + $0x60] sm:$0xff] }
 0x1fa   :  { %v393_v1 = vmul.f32 %v392_v63, %v373_v38  ;;  %v382_v11 = vmul.f32 %v381_v8, %v373_v38  ;;  %v422_v15 = vmul.f32 %v421_v9, %v413_v37  ;;  %v621_v63 = vld [vmem:[#allocation8 + $0x78] sm:$0xff]  ;;  %v616_v8 = vld [vmem:[#allocation8 + $0x50] sm:$0xff]  ;;  %v615_v9 = vld [vmem:[#allocation8 + $0x48] sm:$0xff] }
 0x1fb   :  { %v433_v3 = vmul.f32 %v432_v0, %v413_v37  ;;  %v620_v0 = vld [vmem:[#allocation8 + $0x70] sm:$0xff]  ;;  %622 = vmatpush.msrb.mxu1 %v621_v63 }
 0x1fc   :  { %v394_v5 = vadd.f32 1.0, %v393_v1  ;;  %v383_v18 = vadd.f32 1.1283791, %v382_v11  ;;  %v423_v25 = vadd.f32 1.1283791, %v422_v15  ;;  %v613_v11 = vld [vmem:[#allocation8 + $0x38] sm:$0xff] }
 0x1fd   :  { %v434_v6 = vadd.f32 1.0, %v433_v3  ;;  %623 = vmatpush.msrb.mxu1 %v620_v0 }
 0x1fe   :  { %769 = vrcp.f32 %v394_v5  ;;  %v406_v20 = vand.u32 2147483648, %v394_v5  ;;  %v404_v23 = vand.u32 2147483647, %v394_v5  ;;  %vm400_vm1 = vweird.f32 %v394_v5 }
 0x1ff   :  { %771 = vrcp.f32 %v434_v6  ;;  %v446_v24 = vand.u32 2147483648, %v434_v6  ;;  %v444_v28 = vand.u32 2147483647, %v434_v6  ;;  %vm440_vm3 = vweird.f32 %v434_v6  ;;  %624 = vmatpush.msrb.mxu1 %v619_v2 }
 0x200   :  { %v407_v34 = vor.u32 1.1754944e-38, %v406_v20  ;;  %v384_v12 = vmul.f32 %v383_v18, %v1039_v19  ;;  %vm405_vm4 = vcmp.eq.f32.partialorder %v404_v23, 8.507059e+37  ;;  %v424_v39 = vmul.f32 %v423_v25, %v1036_v33  ;;  %v610_v18 = vld [vmem:[#allocation8 + $0x20] sm:$0xff]  ;;  %v608_v23 = vld [vmem:[#allocation8 + $0x10] sm:$0xff] }
 0x201   :  { %v447_v37 = vor.u32 1.1754944e-38, %v446_v24  ;;  %vm445_vm6 = vcmp.eq.f32.partialorder %v444_v28, 8.507059e+37  ;;  %625 = vmatpush.msrb.mxu1 %v618_v4  ;;  %v544_v24 = vld [vmem:[%s1074_s6] sm:$0x1] }
 0x204   :  { %v770_v10 = vpop.eup %769 }
 0x205   :  { %v772_v13 = vpop.eup %771  ;;  %v396_v14 = vmul.f32 %v770_v10, %v394_v5  ;;  %vm401_vm15 = vweird.f32 %v770_v10 }
 0x206   :  { %v436_v16 = vmul.f32 %v772_v13, %v434_v6  ;;  %vm441_vm0 = vweird.f32 %v772_v13  ;;  %vm402_vm2 = vmor %vm400_vm1, %vm401_vm15  ;;  %v617_v6 = vld [vmem:[#allocation8 + $0x58] sm:$0xff] }
 0x207   :  { %v397_v17 = vsub.f32 1.0, %v396_v14  ;;  %vm442_vm5 = vmor %vm440_vm3, %vm441_vm0  ;;  %626 = vmatpush.msrb.mxu1 %v617_v6  ;;  %v612_v14 = vld [vmem:[#allocation8 + $0x30] sm:$0xff] }
 0x208   :  { %v437_v21 = vsub.f32 1.0, %v436_v16  ;;  %v611_v16 = vld [vmem:[#allocation8 + $0x28] sm:$0xff] }
 0x209   :  { %v398_v22 = vmul.f32 %v770_v10, %v397_v17  ;;  %627 = vmatpush.msrb.mxu1 %v616_v8 }
 0x20a   :  { %v438_v26 = vmul.f32 %v772_v13, %v437_v21  ;;  %v609_v21 = vld [vmem:[#allocation8 + $0x18] sm:$0xff] }
 0x20b   :  { %v399_v30 = vadd.f32 %v770_v10, %v398_v22  ;;  %628 = vmatpush.msrb.mxu1 %v615_v9 }
 0x20c   :  { %v439_v35 = vadd.f32 %v772_v13, %v438_v26  ;;  %v607_v26 = vld [vmem:[#allocation8 + $0x8] sm:$0xff] }
 0x20d   :  { %v403_v36 = vsel %vm402_vm2, %v770_v10, %v399_v30  ;;  %v614_v10 = vld [vmem:[#allocation8 + $0x40] sm:$0xff] }
 0x20e   :  { %v408_v38 = vsel %vm405_vm4, %v407_v34, %v403_v36  ;;  %v443_v40 = vsel %vm442_vm5, %v772_v13, %v439_v35  ;;  %629 = vmatpush.msrb.mxu1 %v614_v10  ;;  %v606_v34 = vld [vmem:[#allocation8] sm:$0xff] }
 0x20f   :  { %v409_v41 = vmul.f32 %v408_v38, %v384_v12  ;;  %v448_v42 = vsel %vm445_vm6, %v447_v37, %v443_v40  ;;  %v757_v12 = vld [vmem:[%s1074_s6 + $0x1] ss:$0 sm:$0xff] }
 0x210   :  { %v449_v32 = vmul.f32 %v448_v42, %v424_v39  ;;  %630 = vmatpush.msrb.mxu1 %v613_v11 }
 0x211   :  { %v742_v43 = vclamps-f32 %v409_v41, 1.0 }
 0x212   :  { %v743_v44 = vclamps-f32 %v449_v32, 1.0  ;;  %631 = vmatpush.msrb.mxu1 %v612_v14 }
 0x213   :  { %v452_v46 = vadd.f32 1.0, %v742_v43 }
 0x214   :  { %v453_v19 = vadd.f32 1.0, %v743_v44  ;;  %632 = vmatpush.msrb.mxu1 %v611_v16 }
 0x215   :  { %v454_v48 = vmul.f32 %v452_v46, %v368_v45 }
 0x216   :  { %v455_v49 = vmul.f32 %v453_v19, %v369_v47  ;;  %633 = vmatpush.msrb.mxu1 %v610_v18 }
 0x217   :  { %504 = vmatmul.f32.vlgmr.msra.gmra.mxu3 %v454_v48 }
 0x218   :  { %524 = vmatmul.f32.vlgmr.msrb.gmra.mxu0 %v455_v49  ;;  %634 = vmatpush.msrb.mxu1 %v609_v21 }
 0x21a   :  { %635 = vmatpush.msrb.mxu1 %v608_v23 }
 0x21c   :  { %636 = vmatpush.msrb.mxu1 %v607_v26 }
 0x21e   :  { %637 = vmatpush.msrb.mxu1 %v606_v34 }
 0x295   :  { %v525_v50 = vpop.f32.mrf.mxu0 }
 0x29a   :  { %v505_v51 = vpop.f32.mrf.mxu3 }
 0x29b   :  { %v526_v33 = vadd.f32 %v525_v50, %v505_v51 }
 0x29d   :  { %v528_v52 = vrot.slane %v526_v33, 4 }
 0x29f   :  { %v529_v53 = vadd.f32 %v528_v52, %v526_v33 }
 0x2a1   :  { %v530_v54 = vrot.slane %v529_v53, 2 }
 0x2a3   :  { %v531_v55 = vadd.f32 %v530_v54, %v529_v53 }
 0x2a5   :  { %v532_v56 = vrot.slane %v531_v55, 1 }
 0x2a7   :  { %v533_v57 = vadd.f32 %v532_v56, %v531_v55 }
 0x2a9   :  { %v534_v58 = vmul.f32 %v533_v57, %v984_v29 }
 0x2ab   :  { %v535_v31 = vsub.f32 %v526_v33, %v534_v58 }
 0x2ad   :  { %v536_v59 = vmul.f32 %v535_v31, %v535_v31 }
 0x2af   :  { %v537_v60 = vrot.slane %v536_v59, 4 }
 0x2b1   :  { %v538_v27 = vadd.f32 %v537_v60, %v536_v59 }
 0x2b3   :  { %v539_v61 = vrot.slane %v538_v27, 2 }
 0x2b5   :  { %v540_v62 = vadd.f32 %v539_v61, %v538_v27 }
 0x2b7   :  { %v541_v1 = vrot.slane %v540_v62, 1 }
 0x2b9   :  { %v542_v3 = vadd.f32 %v541_v1, %v540_v62 }
 0x2bb   :  { %v543_v5 = vmul.f32 %v542_v3, %v984_v29 }
 0x2bd   :  { %v545_v7 = vadd.f32 1e-05, %v543_v5 }
 0x2bf   :  { %773 = vrsqrt.f32 %v545_v7  ;;  %vm552_vm8 = vweird.f32 %v545_v7 }
 0x2c5   :  { %v774_v13 = vpop.eup %773 }
 0x2c6   :  { %v547_v15 = vmul.f32 %v774_v13, %v545_v7  ;;  %vm553_vm7 = vweird.f32 %v774_v13 }
 0x2c7   :  { %vm554_vm9 = vmor %vm552_vm8, %vm553_vm7 }
 0x2c8   :  { %v548_v17 = vmul.f32 %v774_v13, %v547_v15 }
 0x2ca   :  { %v549_v20 = vmul.f32 0.5, %v548_v17 }
 0x2cc   :  { %v550_v22 = vsub.f32 1.5, %v549_v20 }
 0x2ce   :  { %v551_v25 = vmul.f32 %v774_v13, %v550_v22 }
 0x2d0   :  { %v555_v28 = vsel %vm554_vm9, %v774_v13, %v551_v25 }
 0x2d1   :  { %v556_v30 = vmul.f32 %v555_v28, %v544_v24 }
 0x2d3   :  { %v557_v35 = vperm.slane %v556_v30, 0 }
 0x2d5   :  { %v558_v36 = vmul.f32 %v557_v35, %v535_v31 }
 0x2d7   :  { %v561_v37 = vadd.f32 %v757_v12, %v558_v36 }
 0x2d9   :  { %v563_v38 = vmul.f32 0.70710677, %v561_v37  ;;  %v562_v5 = vmul.f32 0.5, %v561_v37  ;;  %v658_v37 = vld [vmem:[%s1076_s8] sm:$0x1] }
 0x2db   :  { %v564_v39 = vmul.f32 %v563_v38, %v563_v38 }
 0x2dd   :  { %v565_v40 = vmin.f32 %v564_v39, 16.0 }
 0x2df   :  { %v566_v41 = vmul.f32 2.1237322e-06, %v565_v40  ;;  %v577_v42 = vmul.f32 3.8918573e-05, %v565_v40 }
 0x2e1   :  { %v567_v32 = vadd.f32 0.00028619796, %v566_v41  ;;  %v578_v43 = vadd.f32 0.001143296, %v577_v42 }
 0x2e3   :  { %v568_v44 = vmul.f32 %v567_v32, %v565_v40  ;;  %v579_v45 = vmul.f32 %v578_v43, %v565_v40 }
 0x2e5   :  { %v580_v46 = vadd.f32 0.014752088, %v579_v45  ;;  %v569_v47 = vadd.f32 0.0036580483, %v568_v44 }
 0x2e7   :  { %v581_v19 = vmul.f32 %v580_v46, %v565_v40  ;;  %v570_v49 = vmul.f32 %v569_v47, %v565_v40 }
 0x2e9   :  { %v582_v48 = vadd.f32 0.112945676, %v581_v19  ;;  %v571_v33 = vadd.f32 0.05243302, %v570_v49 }
 0x2eb   :  { %v583_v50 = vmul.f32 %v582_v48, %v565_v40  ;;  %v572_v54 = vmul.f32 %v571_v33, %v565_v40 }
 0x2ed   :  { %v584_v51 = vadd.f32 0.4994258, %v583_v50  ;;  %v573_v55 = vadd.f32 0.18741608, %v572_v54 }
 0x2ef   :  { %v585_v52 = vmul.f32 %v584_v51, %v565_v40  ;;  %v574_v57 = vmul.f32 %v573_v55, %v565_v40 }
 0x2f1   :  { %v586_v53 = vadd.f32 1.0, %v585_v52  ;;  %v575_v60 = vadd.f32 1.1283791, %v574_v57 }
 0x2f3   :  { %775 = vrcp.f32 %v586_v53  ;;  %v598_v59 = vand.u32 2147483648, %v586_v53  ;;  %v596_v61 = vand.u32 2147483647, %v586_v53  ;;  %vm592_vm11 = vweird.f32 %v586_v53 }
 0x2f4   :  { %v576_v0 = vmul.f32 %v575_v60, %v563_v38 }
 0x2f5   :  { %v599_v63 = vor.u32 1.1754944e-38, %v598_v59  ;;  %vm597_vm13 = vcmp.eq.f32.partialorder %v596_v61, 8.507059e+37 }
 0x2f9   :  { %v776_v56 = vpop.eup %775 }
 0x2fa   :  { %v588_v58 = vmul.f32 %v776_v56, %v586_v53  ;;  %vm593_vm10 = vweird.f32 %v776_v56 }
 0x2fb   :  { %vm594_vm12 = vmor %vm592_vm11, %vm593_vm10 }
 0x2fc   :  { %v589_v31 = vsub.f32 1.0, %v588_v58 }
 0x2fe   :  { %v590_v27 = vmul.f32 %v776_v56, %v589_v31 }
 0x300   :  { %v591_v62 = vadd.f32 %v776_v56, %v590_v27 }
 0x302   :  { %v595_v1 = vsel %vm594_vm12, %v776_v56, %v591_v62 }
 0x303   :  { %v600_v2 = vsel %vm597_vm13, %v599_v63, %v595_v1 }
 0x304   :  { %v601_v3 = vmul.f32 %v600_v2, %v576_v0 }
 0x306   :  { %v744_v4 = vclamps-f32 %v601_v3, 1.0 }
 0x308   :  { %v604_v6 = vadd.f32 1.0, %v744_v4 }
 0x30a   :  { %v605_v7 = vmul.f32 %v604_v6, %v562_v5 }
 0x30c   :  { %638 = vmatmul.f32.vlgmr.msrb.gmra.mxu1 %v605_v7 }
 0x389   :  { %v639_v8 = vpop.f32.mrf.mxu1 }
 0x38a   :  { %v642_v9 = vrot.slane %v639_v8, 4 }
 0x38c   :  { %v643_v10 = vadd.f32 %v642_v9, %v639_v8 }
 0x38e   :  { %v644_v11 = vrot.slane %v643_v10, 2 }
 0x390   :  { %v645_v13 = vadd.f32 %v644_v11, %v643_v10 }
 0x392   :  { %v646_v14 = vrot.slane %v645_v13, 1 }
 0x394   :  { %v647_v15 = vadd.f32 %v646_v14, %v645_v13 }
 0x396   :  { %v648_v16 = vmul.f32 %v647_v15, %v984_v29 }
 0x398   :  { %v649_v17 = vsub.f32 %v639_v8, %v648_v16 }
 0x39a   :  { %v650_v18 = vmul.f32 %v649_v17, %v649_v17 }
 0x39c   :  { %v651_v20 = vrot.slane %v650_v18, 4 }
 0x39e   :  { %v652_v21 = vadd.f32 %v651_v20, %v650_v18 }
 0x3a0   :  { %v653_v22 = vrot.slane %v652_v21, 2 }
 0x3a2   :  { %v654_v23 = vadd.f32 %v653_v22, %v652_v21 }
 0x3a4   :  { %v655_v24 = vrot.slane %v654_v23, 1 }
 0x3a6   :  { %v656_v25 = vadd.f32 %v655_v24, %v654_v23 }
 0x3a8   :  { %v657_v26 = vmul.f32 %v656_v25, %v984_v29  ;;  %v758_v29 = vld [vmem:[%s1076_s8 + $0x1] ss:$0 sm:$0xff]  ;;  %s918_s8 = smov [#allocation10]  }
 0x3a9   :  { %s726_s22 = sshll.u32 %s918_s8, 4  ;;  %s727_s22 = int_to_ptr.vmem [resolvable:$true] %s726_s22 }
 0x3aa   :  { %v659_v28 = vadd.f32 1e-05, %v657_v26 }
 0x3ac   :  { %777 = vrsqrt.f32 %v659_v28  ;;  %vm666_vm15 = vweird.f32 %v659_v28 }
 0x3b2   :  { %v778_v30 = vpop.eup %777 }
 0x3b3   :  { %v661_v34 = vmul.f32 %v778_v30, %v659_v28  ;;  %vm667_vm14 = vweird.f32 %v778_v30 }
 0x3b4   :  { %vm668_vm0 = vmor %vm666_vm15, %vm667_vm14 }
 0x3b5   :  { %v662_v35 = vmul.f32 %v778_v30, %v661_v34 }
 0x3b7   :  { %v663_v12 = vmul.f32 0.5, %v662_v35 }
 0x3b9   :  { %v664_v36 = vsub.f32 1.5, %v663_v12 }
 0x3bb   :  { %v665_v38 = vmul.f32 %v778_v30, %v664_v36 }
 0x3bd   :  { %v669_v39 = vsel %vm668_vm0, %v778_v30, %v665_v38 }
 0x3be   :  { %v670_v40 = vmul.f32 %v669_v39, %v658_v37 }
 0x3c0   :  { %v671_v41 = vperm.slane %v670_v40, 0 }
 0x3c2   :  { %v672_v42 = vmul.f32 %v671_v41, %v649_v17 }
 0x3c4   :  { %v675_v32 = vadd.f32 %v758_v29, %v672_v42 }
 0x3c6   :  { %v677_v43 = vmul.f32 0.70710677, %v675_v32  ;;  %v676_v11 = vmul.f32 0.5, %v675_v32 }
 0x3c8   :  { %v678_v44 = vmul.f32 %v677_v43, %v677_v43 }
 0x3ca   :  { %v679_v45 = vmin.f32 %v678_v44, 16.0 }
 0x3cc   :  { %v680_v46 = vmul.f32 2.1237322e-06, %v679_v45  ;;  %v691_v47 = vmul.f32 3.8918573e-05, %v679_v45 }
 0x3ce   :  { %v681_v19 = vadd.f32 0.00028619796, %v680_v46  ;;  %v692_v48 = vadd.f32 0.001143296, %v691_v47 }
 0x3d0   :  { %v682_v49 = vmul.f32 %v681_v19, %v679_v45  ;;  %v693_v50 = vmul.f32 %v692_v48, %v679_v45 }
 0x3d2   :  { %v694_v51 = vadd.f32 0.014752088, %v693_v50  ;;  %v683_v33 = vadd.f32 0.0036580483, %v682_v49 }
 0x3d4   :  { %v695_v52 = vmul.f32 %v694_v51, %v679_v45  ;;  %v684_v54 = vmul.f32 %v683_v33, %v679_v45 }
 0x3d6   :  { %v696_v53 = vadd.f32 0.112945676, %v695_v52  ;;  %v685_v57 = vadd.f32 0.05243302, %v684_v54 }
 0x3d8   :  { %v697_v55 = vmul.f32 %v696_v53, %v679_v45  ;;  %v686_v59 = vmul.f32 %v685_v57, %v679_v45 }
 0x3da   :  { %v698_v56 = vadd.f32 0.4994258, %v697_v55  ;;  %v687_v60 = vadd.f32 0.18741608, %v686_v59 }
 0x3dc   :  { %v699_v58 = vmul.f32 %v698_v56, %v679_v45  ;;  %v688_v61 = vmul.f32 %v687_v60, %v679_v45 }
 0x3de   :  { %v700_v31 = vadd.f32 1.0, %v699_v58  ;;  %v689_v1 = vadd.f32 1.1283791, %v688_v61 }
 0x3e0   :  { %779 = vrcp.f32 %v700_v31  ;;  %v712_v0 = vand.u32 2147483648, %v700_v31  ;;  %v710_v3 = vand.u32 2147483647, %v700_v31  ;;  %vm706_vm2 = vweird.f32 %v700_v31 }
 0x3e1   :  { %v690_v6 = vmul.f32 %v689_v1, %v677_v43 }
 0x3e2   :  { %v713_v5 = vor.u32 1.1754944e-38, %v712_v0  ;;  %vm711_vm4 = vcmp.eq.f32.partialorder %v710_v3, 8.507059e+37 }
 0x3e6   :  { %v780_v27 = vpop.eup %779 }
 0x3e7   :  { %v702_v62 = vmul.f32 %v780_v27, %v700_v31  ;;  %vm707_vm1 = vweird.f32 %v780_v27 }
 0x3e8   :  { %vm708_vm3 = vmor %vm706_vm2, %vm707_vm1 }
 0x3e9   :  { %v703_v63 = vsub.f32 1.0, %v702_v62 }
 0x3eb   :  { %v704_v2 = vmul.f32 %v780_v27, %v703_v63 }
 0x3ed   :  { %v705_v4 = vadd.f32 %v780_v27, %v704_v2 }
 0x3ef   :  { %v709_v7 = vsel %vm708_vm3, %v780_v27, %v705_v4 }
 0x3f0   :  { %v714_v8 = vsel %vm711_vm4, %v713_v5, %v709_v7 }
 0x3f1   :  { %v715_v9 = vmul.f32 %v714_v8, %v690_v6 }
 0x3f3   :  { %v745_v10 = vclamps-f32 %v715_v9, 1.0 }
 0x3f5   :  { %v718_v13 = vadd.f32 1.0, %v745_v10 }
 0x3f7   :  { %v719_v14 = vmul.f32 %v718_v13, %v676_v11 }
 0x3f9   :  { %720 = vst [vmem:[#allocation10] sm:$0xff] %v719_v14 }
 0x3fa   :  { %731 = dma.vmem_to_hbm [thread:$0]  %s727_s22, 128, %s729_s24, [#allocation4]  }
 0x3fb   :  { %907 = dma.done.wait [#allocation4], 128  }
 0x3fc   :  { %908 = vsyncadd [#allocation4], 4294967168 }
 0x3fd   :  { %736 = vsyncpa [#allocation3], 1 }
 0x3fe   :  { %737 = vsyncpa [#allocation6], 1 }
 0x3ff   :  { %738 = vsyncpa [#allocation9], 1 }
 0x400   :  { %739 = vsyncpa [#allocation4], 1 }

</bundles_post_ra>
